<compile_context>
chip_gen: v6e
topology: v6e:2x2x1
jax: 0.10.0
libtpu: 0.0.40
codegen_flags: <defaults>
</compile_context>

<pallas_src>
import jax
import jax.numpy as jnp
from jax.experimental import pallas as pl
from jax.experimental.pallas import tpu as pltpu

HIDDEN = 768  # fixed by nn.Linear(768, 768)


def _round_up(n, m):
    return ((n + m - 1) // m) * m


def pooler_kernel(x_ref, w_ref, b_ref, o_ref):
    # x_ref: (tm, H) f32, w_ref: (H, H) bf16 (pre-transposed to [in, out]),
    # b_ref: (1, H) f32, o_ref: (tm, H)
    x = x_ref[...].astype(jnp.bfloat16)          # MXU-native operand dtype
    y = jnp.dot(x, w_ref[...], preferred_element_type=jnp.float32)
    y = y + b_ref[...]                           # bias broadcast over rows (f32)
    o_ref[...] = jnp.tanh(y).astype(o_ref.dtype)  # tanh epilogue in f32


def prepare_pooler_params(weight, bias):
    """One-time parameter prep, OUTSIDE the per-call forward path.

    weight: PyTorch nn.Linear layout [out, in] -> transposed [in, out] bf16
    bias:   [H] -> (1, H) f32 (2D for TPU layout)
    """
    w_t_bf16 = jnp.asarray(weight).T.astype(jnp.bfloat16)
    b2d = jnp.asarray(bias, jnp.float32).reshape(1, -1)
    return w_t_bf16, b2d


def bert_pooler(hidden_states, w_t_bf16, bias_2d, *, block_m=256):
    """hidden_states: [B, 768] f32; w_t_bf16: [768, 768] bf16 (already [in,out]);
    bias_2d: [1, 768] f32. Returns tanh(hidden_states @ W + b), shape [B, 768]."""
    B, H = hidden_states.shape
    assert H == HIDDEN
    assert w_t_bf16.shape == (H, H)
    assert bias_2d.shape == (1, H)

    # M-tile: multiple of 8 (sublane), capped at block_m; weight stays resident.
    tm = min(block_m, _round_up(B, 8))
    grid_m = pl.cdiv(B, tm)

    out_dtype = hidden_states.dtype
    bytes_accessed = (
        hidden_states.size * hidden_states.dtype.itemsize      # x read
        + w_t_bf16.size * w_t_bf16.dtype.itemsize              # weight read (bf16)
        + bias_2d.size * bias_2d.dtype.itemsize                # bias read
        + B * H * jnp.dtype(out_dtype).itemsize                # output write
    )
    cost = pl.CostEstimate(
        flops=2 * B * H * H,
        transcendentals=B * H,
        bytes_accessed=bytes_accessed,
    )

    return pl.pallas_call(
        pooler_kernel,
        out_shape=jax.ShapeDtypeStruct((B, H), out_dtype),
        grid_spec=pltpu.PrefetchScalarGridSpec(
            num_scalar_prefetch=0,
            grid=(grid_m,),
            in_specs=[
                pl.BlockSpec((tm, H), lambda i: (i, 0)),   # x: tiled over batch
                pl.BlockSpec((H, H), lambda i: (0, 0)),    # weight: resident
                pl.BlockSpec((1, H), lambda i: (0, 0)),    # bias: resident
            ],
            out_specs=pl.BlockSpec((tm, H), lambda i: (i, 0)),
        ),
        compiler_params=pltpu.CompilerParams(
            dimension_semantics=("parallel",),             # shards M across TCs on v7x
            vmem_limit_bytes=32 * 1024 * 1024,             # headroom; fits v5e/v6e/v7x
        ),
        cost_estimate=cost,
    )(hidden_states, w_t_bf16, bias_2d)


if __name__ == "__main__":
    key = jax.random.PRNGKey(0)
    k_x, k_w, k_b = jax.random.split(key, 3)

    B = 8  # small batch; hidden dim fixed at 768 by the module
    x = jax.random.normal(k_x, (B, HIDDEN), dtype=jnp.float32)
    # Deterministic synthetic parameters (PyTorch nn.Linear layout: [out, in])
    weight = jax.random.normal(k_w, (HIDDEN, HIDDEN), dtype=jnp.float32) * 0.02
    bias = jax.random.normal(k_b, (HIDDEN,), dtype=jnp.float32) * 0.02

    # One-time parameter prep (transpose + bf16 cast) -- NOT in the hot path.
    w_t_bf16, b2d = prepare_pooler_params(weight, bias)
    w_t_bf16 = jax.block_until_ready(w_t_bf16)
    b2d = jax.block_until_ready(b2d)

    out = bert_pooler(x, w_t_bf16, b2d)
    out = jax.block_until_ready(out)

    # Reference check in plain JAX (f32). bf16 weight/activation path => looser tol.
    ref = jnp.tanh(x @ weight.T + bias)
    assert out.shape == (B, HIDDEN)
    assert jnp.allclose(out, ref, atol=2e-2, rtol=2e-2)

    print("KERNEL_OK")
</pallas_src>

<mosaic_0001>
module attributes {stable_mosaic.version = 11 : i64} {
  func.func @pooler_kernel(%arg0: i32, %arg1: memref<8x768xf32, #tpu.memory_space<vmem>>, %arg2: memref<768x768xbf16, #tpu.memory_space<vmem>>, %arg3: memref<1x768xf32, #tpu.memory_space<vmem>>, %arg4: memref<8x768xf32, #tpu.memory_space<vmem>>) attributes {dimension_semantics = [#tpu.dimension_semantics<parallel>], iteration_bounds = array<i64: 1>, scalar_prefetch = 0 : i64, scratch_operands = 0 : i64, tpu.core_type = #tpu.core_type<tc>, window_params = [{transform_indices = @transform_0, window_bounds = array<i64: 8, 768>}, {pipeline_mode = #tpu.pipeline_mode<synchronous>, transform_indices = @transform_1, window_bounds = array<i64: 768, 768>}, {pipeline_mode = #tpu.pipeline_mode<synchronous>, transform_indices = @transform_2, window_bounds = array<i64: 1, 768>}, {transform_indices = @transform_3, window_bounds = array<i64: 8, 768>}]} {
    %c0 = arith.constant 0 : index
    %c0_0 = arith.constant 0 : index
    %0 = vector.load %arg1[%c0, %c0_0] : memref<8x768xf32, #tpu.memory_space<vmem>>, vector<8x768xf32>
    %1 = arith.truncf %0 : vector<8x768xf32> to vector<8x768xbf16>
    %c0_1 = arith.constant 0 : index
    %c0_2 = arith.constant 0 : index
    %2 = vector.load %arg2[%c0_1, %c0_2] : memref<768x768xbf16, #tpu.memory_space<vmem>>, vector<768x768xbf16>
    %cst = arith.constant dense<0.000000e+00> : vector<8x768xf32>
    %3 = tpu.matmul %1, %2, %cst {dimension_numbers = #tpu.dot_dimension_numbers<[1], [0], [0], [1], [0, 0, 1, 1], [], []>} : vector<8x768xbf16>, vector<768x768xbf16>, vector<8x768xf32> -> vector<8x768xf32>
    %c0_3 = arith.constant 0 : index
    %c0_4 = arith.constant 0 : index
    %4 = vector.load %arg3[%c0_3, %c0_4] : memref<1x768xf32, #tpu.memory_space<vmem>>, vector<1x768xf32>
    %5 = vector.broadcast %4 : vector<1x768xf32> to vector<8x768xf32>
    %6 = arith.addf %3, %5 : vector<8x768xf32>
    %7 = math.tanh %6 : vector<8x768xf32>
    %c0_5 = arith.constant 0 : index
    %c0_6 = arith.constant 0 : index
    %8 = vector.load %arg4[%c0_5, %c0_6] : memref<8x768xf32, #tpu.memory_space<vmem>>, vector<8x768xf32>
    tpu.vector_store %arg4[%c0_5, %c0_6], %7 {strides = array<i32>} : memref<8x768xf32, #tpu.memory_space<vmem>>, vector<8x768xf32>,
    return
  }
  func.func @transform_0(%arg0: i32) -> (i32, i32) {
    %c0_i32 = arith.constant 0 : i32
    %c0_i32_0 = arith.constant 0 : i32
    return %arg0, %c0_i32 : i32, i32
  }
  func.func @transform_1(%arg0: i32) -> (i32, i32) {
    %c0_i32 = arith.constant 0 : i32
    %c0_i32_0 = arith.constant 0 : i32
    %c0_i32_1 = arith.constant 0 : i32
    return %c0_i32, %c0_i32_0 : i32, i32
  }
  func.func @transform_2(%arg0: i32) -> (i32, i32) {
    %c0_i32 = arith.constant 0 : i32
    %c0_i32_0 = arith.constant 0 : i32
    %c0_i32_1 = arith.constant 0 : i32
    return %c0_i32, %c0_i32_0 : i32, i32
  }
  func.func @transform_3(%arg0: i32) -> (i32, i32) {
    %c0_i32 = arith.constant 0 : i32
    %c0_i32_0 = arith.constant 0 : i32
    return %arg0, %c0_i32 : i32, i32
  }
}

</mosaic_0001>

<bundles_post_ra>
// kernel: tpu_custom_call.1
= control target key start
LH: loop header
LB: loop body
LE: loop exit
PB: predicated region body
PF: predicated region fallthrough
CT: control target
= control target key end

     0   :  { %8 = vsyncpa [#allocation3], 0  ;;  %s3141_s0 = inlined_call_operand.hbm [shape: f32[8,768], index: 0, kind: input, shape index: {}]   ;;  %s3142_s1 = inlined_call_operand.hbm [shape: bf16[768,768], index: 1, kind: input, shape index: {}]   ;;  %s3143_s2 = inlined_call_operand.hbm [shape: f32[1,768], index: 2, kind: input, shape index: {}]   ;;  %s3144_s3 = inlined_call_operand.hbm [shape: f32[8,768], index: 3, kind: output, shape index: {}]  }
   0x1   :  { %9 = vsyncpa [#allocation6], 0 }
   0x2   :  { %10 = vsyncpa [#allocation4], 0  ;;  %s3045_s12 = smov [#allocation5]  }
   0x3   :  { %s26_s13 = sshll.u32 %s3045_s12, 4  ;;  %s27_s13 = int_to_ptr.vmem [resolvable:$true] %s26_s13 }
   0x4   :  { %s2967_s14 = scalar_lea.vmem %s27_s13, 36864  ;;  %p2972_p1 = scmp.lt.s32.totalorder %s27_s13, %s27_s13 }
   0x5   :  { %p2968_p0 = scmp.ne.s32.totalorder %s27_s13, %s2967_s14  ;;  %p2973_p2 = scmp.lt.s32.totalorder %s2967_s14, %s2967_s14 }
   0x7   :  { %p2974_p3 = por %p2973_p2, %p2972_p1 }
   0x9   :  { %p2975_p4 = pnand %p2974_p3, %p2968_p0 }
   0xb   :  { %2978 = shalt.err (!%p2975_p4)
}
   0xc   :  { %s3046_s15 = smov 384   ;;  %s3047_s16 = smov 24  }
   0xd   :  { %32 = dma.hbm_to_vmem [thread:$0]  %s3142_s1, 36864, %s27_s13, [#allocation6], %s3046_s15, %s3046_s15, %s3047_s16  }
   0xe   :  { %s3048_s19 = smov [#allocation2]   ;;  %s3049_s21 = smov [#allocation7]  }
   0xf   :  { %s17_s20 = sshll.u32 %s3048_s19, 4  ;;  %s39_s22 = sshll.u32 %s3049_s21, 4  ;;  %s18_s20 = int_to_ptr.vmem [resolvable:$true] %s17_s20  ;;  %s40_s22 = int_to_ptr.vmem [resolvable:$true] %s39_s22 }
  0x10   :  { %s2987_s23 = scalar_lea.vmem %s18_s20, 768  ;;  %p2992_p6 = scmp.lt.s32.totalorder %s18_s20, %s18_s20 }
  0x11   :  { %p2988_p5 = scmp.ne.s32.totalorder %s18_s20, %s2987_s23  ;;  %p2993_p7 = scmp.lt.s32.totalorder %s2987_s23, %s2987_s23 }
  0x13   :  { %p2994_p8 = por %p2993_p7, %p2992_p6 }
  0x15   :  { %p2995_p9 = pnand %p2994_p8, %p2988_p5 }
  0x17   :  { %2998 = shalt.err (!%p2995_p9)
}
  0x18   :  { %20 = dma.hbm_to_vmem [thread:$0]  %s3141_s0, 768, %s18_s20, [#allocation3]  }
  0x19   :  { %s3007_s26 = scalar_lea.vmem %s40_s22, 96  ;;  %p3012_p11 = scmp.lt.s32.totalorder %s40_s22, %s40_s22 }
  0x1a   :  { %p3008_p10 = scmp.ne.s32.totalorder %s40_s22, %s3007_s26  ;;  %p3013_p12 = scmp.lt.s32.totalorder %s3007_s26, %s3007_s26 }
  0x1c   :  { %p3014_p13 = por %p3013_p12, %p3012_p11 }
  0x1e   :  { %p3015_p0 = pnand %p3014_p13, %p3008_p10 }
  0x20   :  { %3018 = shalt.err (!%p3015_p0)
}
  0x21   :  { %42 = dma.hbm_to_vmem [thread:$0]  %s3143_s2, 96, %s40_s22, [#allocation6]  }
  0x22   :  { %3039 = dma.done.wait [#allocation3], 768  }
  0x23   :  { %3040 = vsyncadd [#allocation3], 4294966528 }
  0x24   :  { %3041 = dma.done.wait [#allocation6], 36960  }
  0x25   :  { %3042 = vsyncadd [#allocation6], 4294930336  ;;  %v2515_v0 = vld [vmem:[#allocation5 + $0x154] ss:$24 sps:$4 sm:$0xff]   ;;  %v2517_v1 = vld [vmem:[#allocation5 + $0x150] ss:$24 sps:$4 sm:$0xff]  }
  0x26   :  { %1824 = vmatprep.subr.bf16.mxu0 %v2515_v0  ;;  %v2518_v2 = vld [vmem:[#allocation5 + $0x454] ss:$24 sps:$4 sm:$0xff]   ;;  %v2520_v3 = vld [vmem:[#allocation5 + $0x450] ss:$24 sps:$4 sm:$0xff]   ;;  %v2521_v4 = vld [vmem:[#allocation5 + $0x124] ss:$24 sps:$4 sm:$0xff]  }
  0x27   :  { %1825 = vmatpush1.bf16.msra.mxu0 %v2517_v1  ;;  %v2523_v5 = vld [vmem:[#allocation5 + $0x120] ss:$24 sps:$4 sm:$0xff]   ;;  %1865 = vmatprep.subr.bf16.mxu1 %v2518_v2  ;;  %v2524_v6 = vld [vmem:[#allocation5 + $0x424] ss:$24 sps:$4 sm:$0xff]   ;;  %v2527_v8 = vld [vmem:[#allocation5 + $0xf4] ss:$24 sps:$4 sm:$0xff]  }
  0x28   :  { %1866 = vmatpush1.bf16.msra.mxu1 %v2520_v3  ;;  %1826 = vmatprep.subr.bf16.mxu0 %v2521_v4  ;;  %v2526_v7 = vld [vmem:[#allocation5 + $0x420] ss:$24 sps:$4 sm:$0xff]   ;;  %v2529_v9 = vld [vmem:[#allocation5 + $0xf0] ss:$24 sps:$4 sm:$0xff]   ;;  %v2530_v10 = vld [vmem:[#allocation5 + $0x3f4] ss:$24 sps:$4 sm:$0xff]  }
  0x29   :  { %1867 = vmatprep.subr.bf16.mxu1 %v2524_v6  ;;  %v2533_v11 = vld [vmem:[#allocation5 + $0xc4] ss:$24 sps:$4 sm:$0xff]   ;;  %v2532_v12 = vld [vmem:[#allocation5 + $0x3f0] ss:$24 sps:$4 sm:$0xff]   ;;  %v2535_v14 = vld [vmem:[#allocation5 + $0xc0] ss:$24 sps:$4 sm:$0xff]  }
  0x2a   :  { %v2536_v13 = vld [vmem:[#allocation5 + $0x3c4] ss:$24 sps:$4 sm:$0xff]   ;;  %v2539_v15 = vld [vmem:[#allocation5 + $0x94] ss:$24 sps:$4 sm:$0xff]   ;;  %v2538_v16 = vld [vmem:[#allocation5 + $0x3c0] ss:$24 sps:$4 sm:$0xff]  }
  0x2b   :  { %1827 = vmatpush1.bf16.msra.mxu0 %v2523_v5  ;;  %v2542_v17 = vld [vmem:[#allocation5 + $0x394] ss:$24 sps:$4 sm:$0xff]   ;;  %v2541_v18 = vld [vmem:[#allocation5 + $0x90] ss:$24 sps:$4 sm:$0xff]   ;;  %v2545_v19 = vld [vmem:[#allocation5 + $0x64] ss:$24 sps:$4 sm:$0xff]  }
  0x2c   :  { %1828 = vmatprep.subr.bf16.mxu0 %v2527_v8  ;;  %1868 = vmatpush1.bf16.msra.mxu1 %v2526_v7  ;;  %v2544_v20 = vld [vmem:[#allocation5 + $0x390] ss:$24 sps:$4 sm:$0xff]   ;;  %v2548_v21 = vld [vmem:[#allocation5 + $0x364] ss:$24 sps:$4 sm:$0xff]   ;;  %v2547_v22 = vld [vmem:[#allocation5 + $0x60] ss:$24 sps:$4 sm:$0xff]  }
  0x2d   :  { %1869 = vmatprep.subr.bf16.mxu1 %v2530_v10  ;;  %v2551_v23 = vld [vmem:[#allocation5 + $0x34] ss:$24 sps:$4 sm:$0xff]   ;;  %v2550_v24 = vld [vmem:[#allocation5 + $0x360] ss:$24 sps:$4 sm:$0xff]   ;;  %v2553_v26 = vld [vmem:[#allocation5 + $0x30] ss:$24 sps:$4 sm:$0xff]  }
  0x2e   :  { %v2554_v25 = vld [vmem:[#allocation5 + $0x334] ss:$24 sps:$4 sm:$0xff]   ;;  %v2557_v27 = vld [vmem:[#allocation5 + $0x4] ss:$24 sps:$4 sm:$0xff]   ;;  %v2556_v28 = vld [vmem:[#allocation5 + $0x330] ss:$24 sps:$4 sm:$0xff]  }
  0x2f   :  { %1829 = vmatpush1.bf16.msra.mxu0 %v2529_v9  ;;  %v2560_v29 = vld [vmem:[#allocation5 + $0x304] ss:$24 sps:$4 sm:$0xff]   ;;  %v2559_v30 = vld [vmem:[#allocation5] ss:$24 sps:$4 sm:$0xff]   ;;  %v2563_v31 = vld [vmem:[#allocation5 + $0x2d4] ss:$24 sps:$4 sm:$0xff]  }
  0x30   :  { %1830 = vmatprep.subr.bf16.mxu0 %v2533_v11  ;;  %1870 = vmatpush1.bf16.msra.mxu1 %v2532_v12  ;;  %v2562_v32 = vld [vmem:[#allocation5 + $0x300] ss:$24 sps:$4 sm:$0xff]   ;;  %v2566_v33 = vld [vmem:[#allocation5 + $0x5d4] ss:$24 sps:$4 sm:$0xff]   ;;  %v2565_v34 = vld [vmem:[#allocation5 + $0x2d0] ss:$24 sps:$4 sm:$0xff]  }
  0x31   :  { %1871 = vmatprep.subr.bf16.mxu1 %v2536_v13  ;;  %v2569_v35 = vld [vmem:[#allocation5 + $0x2a4] ss:$24 sps:$4 sm:$0xff]   ;;  %v2568_v36 = vld [vmem:[#allocation5 + $0x5d0] ss:$24 sps:$4 sm:$0xff]   ;;  %v2571_v38 = vld [vmem:[#allocation5 + $0x2a0] ss:$24 sps:$4 sm:$0xff]  }
  0x32   :  { %v2572_v37 = vld [vmem:[#allocation5 + $0x5a4] ss:$24 sps:$4 sm:$0xff]   ;;  %v2575_v39 = vld [vmem:[#allocation5 + $0x274] ss:$24 sps:$4 sm:$0xff]   ;;  %v2574_v40 = vld [vmem:[#allocation5 + $0x5a0] ss:$24 sps:$4 sm:$0xff]  }
  0x33   :  { %1831 = vmatpush1.bf16.msra.mxu0 %v2535_v14  ;;  %v2578_v41 = vld [vmem:[#allocation5 + $0x574] ss:$24 sps:$4 sm:$0xff]   ;;  %v2577_v42 = vld [vmem:[#allocation5 + $0x270] ss:$24 sps:$4 sm:$0xff]   ;;  %v2581_v43 = vld [vmem:[#allocation5 + $0x244] ss:$24 sps:$4 sm:$0xff]  }
  0x34   :  { %1832 = vmatprep.subr.bf16.mxu0 %v2539_v15  ;;  %1872 = vmatpush1.bf16.msra.mxu1 %v2538_v16  ;;  %v2580_v44 = vld [vmem:[#allocation5 + $0x570] ss:$24 sps:$4 sm:$0xff]   ;;  %v2584_v45 = vld [vmem:[#allocation5 + $0x544] ss:$24 sps:$4 sm:$0xff]   ;;  %v2583_v47 = vld [vmem:[#allocation5 + $0x240] ss:$24 sps:$4 sm:$0xff]  }
  0x35   :  { %1873 = vmatprep.subr.bf16.mxu1 %v2542_v17  ;;  %v53_v46 = vld [vmem:[#allocation2 + $0x8] sm:$0xff]  ;;  %v2587_v49 = vld [vmem:[#allocation5 + $0x214] ss:$24 sps:$4 sm:$0xff]   ;;  %v2589_v54 = vld [vmem:[#allocation5 + $0x210] ss:$24 sps:$4 sm:$0xff]   ;;  %s3050_s0 = smov [#allocation8]  }
  0x36   :  { %v3080_v48 = vpack.c.bf16 %v53_v46, %v53_v46  ;;  %v55_v50 = vld [vmem:[#allocation2 + $0x18] sm:$0xff]  ;;  %v2586_v51 = vld [vmem:[#allocation5 + $0x540] ss:$24 sps:$4 sm:$0xff]   ;;  %v2593_v55 = vld [vmem:[#allocation5 + $0x1e4] ss:$24 sps:$4 sm:$0xff]   ;;  %s2211_s2 = sshll.u32 %s3050_s0, 4  ;;  %s2212_s2 = int_to_ptr.vmem [resolvable:$true] %s2211_s2 }
  0x37   :  { %1833 = vmatpush1.bf16.msra.mxu0 %v2541_v18  ;;  %v3083_v52 = vpack.c.bf16 %v55_v50, %v55_v50  ;;  %v2590_v53 = vld [vmem:[#allocation5 + $0x514] ss:$24 sps:$4 sm:$0xff]   ;;  %v2592_v56 = vld [vmem:[#allocation5 + $0x510] ss:$24 sps:$4 sm:$0xff]   ;;  %v2596_v57 = vld [vmem:[#allocation5 + $0x4e4] ss:$24 sps:$4 sm:$0xff]   ;;  %p3024_p2 = scmp.lt.s32.totalorder %s2212_s2, %s2212_s2 }
  0x38   :  { %1834 = vmatprep.subr.bf16.mxu0 %v2545_v19  ;;  %1874 = vmatpush1.bf16.msra.mxu1 %v2544_v20  ;;  %v2595_v58 = vld [vmem:[#allocation5 + $0x1e0] ss:$24 sps:$4 sm:$0xff]   ;;  %v2599_v59 = vld [vmem:[#allocation5 + $0x1b4] ss:$24 sps:$4 sm:$0xff]   ;;  %v2601_v62 = vld [vmem:[#allocation5 + $0x1b0] ss:$24 sps:$4 sm:$0xff]  }
  0x39   :  { %1875 = vmatprep.subr.bf16.mxu1 %v2548_v21  ;;  %1856 = vmatprep.mubr.bf16.mxu0 %v3080_v48  ;;  %v2598_v60 = vld [vmem:[#allocation5 + $0x4e0] ss:$24 sps:$4 sm:$0xff]   ;;  %v2602_v61 = vld [vmem:[#allocation5 + $0x4b4] ss:$24 sps:$4 sm:$0xff]   ;;  %v2605_v63 = vld [vmem:[#allocation5 + $0x184] ss:$24 sps:$4 sm:$0xff]  }
  0x3a   :  { %1897 = vmatprep.mubr.bf16.mxu1 %v3083_v52  ;;  %v2604_v0 = vld [vmem:[#allocation5 + $0x4b0] ss:$24 sps:$4 sm:$0xff]   ;;  %v2607_v1 = vld [vmem:[#allocation5 + $0x180] ss:$24 sps:$4 sm:$0xff]   ;;  %v2608_v2 = vld [vmem:[#allocation5 + $0x484] ss:$24 sps:$4 sm:$0xff]  }
  0x3b   :  { %1835 = vmatpush1.bf16.msra.mxu0 %v2547_v22  ;;  %v2610_v3 = vld [vmem:[#allocation5 + $0x480] ss:$24 sps:$4 sm:$0xff]   ;;  %v52_v4 = vld [vmem:[#allocation2] sm:$0xff]  ;;  %v2619_v11 = vld [vmem:[#allocation5 + $0x724] ss:$24 sps:$4 sm:$0xff]   ;;  %s3019_s28 = scalar_lea.vmem %s2212_s2, 768 }
  0x3c   :  { %1836 = vmatprep.subr.bf16.mxu0 %v2551_v23  ;;  %1876 = vmatpush1.bf16.msra.mxu1 %v2550_v24  ;;  %v2613_v5 = vld [vmem:[#allocation5 + $0x754] ss:$24 sps:$4 sm:$0xff]   ;;  %v54_v6 = vld [vmem:[#allocation2 + $0x10] sm:$0xff]  ;;  %v3086_v7 = vpack.c.bf16 %v52_v4, %v52_v4  ;;  %v2611_v9 = vld [vmem:[#allocation5 + $0x750] ss:$24 sps:$4 sm:$0xff]   ;;  %p3020_p1 = scmp.ne.s32.totalorder %s2212_s2, %s3019_s28  ;;  %p3025_p3 = scmp.lt.s32.totalorder %s3019_s28, %s3019_s28 }
  0x3d   :  { %1877 = vmatprep.subr.bf16.mxu1 %v2554_v25  ;;  %v2616_v8 = vld [vmem:[#allocation5 + $0x15c] ss:$24 sps:$4 sm:$0xff]   ;;  %v3088_v10 = vpack.c.bf16 %v54_v6, %v54_v6  ;;  %v2614_v12 = vld [vmem:[#allocation5 + $0x158] ss:$24 sps:$4 sm:$0xff]   ;;  %v2622_v13 = vld [vmem:[#allocation5 + $0x12c] ss:$24 sps:$4 sm:$0xff]  }
  0x3e   :  { %v2617_v14 = vld [vmem:[#allocation5 + $0x720] ss:$24 sps:$4 sm:$0xff]   ;;  %v2625_v15 = vld [vmem:[#allocation5 + $0x6f4] ss:$24 sps:$4 sm:$0xff]   ;;  %v2623_v18 = vld [vmem:[#allocation5 + $0x6f0] ss:$24 sps:$4 sm:$0xff]   ;;  %p3026_p4 = por %p3025_p3, %p3024_p2 }
  0x3f   :  { %1837 = vmatpush1.bf16.msra.mxu0 %v2553_v26  ;;  %v2620_v16 = vld [vmem:[#allocation5 + $0x128] ss:$24 sps:$4 sm:$0xff]   ;;  %v2628_v17 = vld [vmem:[#allocation5 + $0xfc] ss:$24 sps:$4 sm:$0xff]   ;;  %v2626_v20 = vld [vmem:[#allocation5 + $0xf8] ss:$24 sps:$4 sm:$0xff]  }
  0x40   :  { %1838 = vmatprep.subr.bf16.mxu0 %v2557_v27  ;;  %1878 = vmatpush1.bf16.msra.mxu1 %v2556_v28  ;;  %v2631_v19 = vld [vmem:[#allocation5 + $0x6c4] ss:$24 sps:$4 sm:$0xff]   ;;  %v2629_v22 = vld [vmem:[#allocation5 + $0x6c0] ss:$24 sps:$4 sm:$0xff]   ;;  %v2637_v23 = vld [vmem:[#allocation5 + $0x694] ss:$24 sps:$4 sm:$0xff]   ;;  %p3027_p5 = pnand %p3026_p4, %p3020_p1 }
  0x41   :  { %1879 = vmatprep.subr.bf16.mxu1 %v2560_v29  ;;  %v2634_v21 = vld [vmem:[#allocation5 + $0xcc] ss:$24 sps:$4 sm:$0xff]   ;;  %v2632_v24 = vld [vmem:[#allocation5 + $0xc8] ss:$24 sps:$4 sm:$0xff]   ;;  %v2640_v25 = vld [vmem:[#allocation5 + $0x9c] ss:$24 sps:$4 sm:$0xff]  }
  0x42   :  { %v2635_v26 = vld [vmem:[#allocation5 + $0x690] ss:$24 sps:$4 sm:$0xff]   ;;  %v2643_v27 = vld [vmem:[#allocation5 + $0x664] ss:$24 sps:$4 sm:$0xff]   ;;  %v2673_v50 = vld [vmem:[#allocation5 + $0x874] ss:$24 sps:$4 sm:$0xff]  }
  0x43   :  { %1839 = vmatpush1.bf16.msra.mxu0 %v2559_v30  ;;  %v2638_v28 = vld [vmem:[#allocation5 + $0x98] ss:$24 sps:$4 sm:$0xff]   ;;  %v2646_v29 = vld [vmem:[#allocation5 + $0x6c] ss:$24 sps:$4 sm:$0xff]   ;;  %v2692_v4 = vld [vmem:[#allocation5 + $0x1e8] ss:$24 sps:$4 sm:$0xff]  }
  0x44   :  { %1840 = vmatprep.subr.bf16.mxu0 %v2563_v31  ;;  %1880 = vmatpush1.bf16.msra.mxu1 %v2562_v32  ;;  %v2641_v30 = vld [vmem:[#allocation5 + $0x660] ss:$24 sps:$4 sm:$0xff]   ;;  %v2649_v31 = vld [vmem:[#allocation5 + $0x634] ss:$24 sps:$4 sm:$0xff]   ;;  %v2695_v6 = vld [vmem:[#allocation5 + $0x7b0] ss:$24 sps:$4 sm:$0xff]  }
  0x45   :  { %1881 = vmatprep.subr.bf16.mxu1 %v2566_v33  ;;  %v2644_v32 = vld [vmem:[#allocation5 + $0x68] ss:$24 sps:$4 sm:$0xff]   ;;  %v2652_v33 = vld [vmem:[#allocation5 + $0x3c] ss:$24 sps:$4 sm:$0xff]   ;;  %v2662_v46 = vld [vmem:[#allocation5 + $0x2d8] ss:$24 sps:$4 sm:$0xff]  }
  0x47   :  { %1841 = vmatpush2.bf16.msra.mxu0 %v2565_v34  ;;  %v57_v34 = vld [vmem:[#allocation2 + $0x28] sm:$0xff] }
  0x48   :  { %1842 = vmatprep.subr.bf16.mxu0 %v2569_v35  ;;  %1882 = vmatpush2.bf16.msra.mxu1 %v2568_v36  ;;  %v2647_v35 = vld [vmem:[#allocation5 + $0x630] ss:$24 sps:$4 sm:$0xff]   ;;  %v3093_v36 = vpack.c.bf16 %v57_v34, %v57_v34 }
  0x49   :  { %1883 = vmatprep.subr.bf16.mxu1 %v2572_v37  ;;  %v2655_v37 = vld [vmem:[#allocation5 + $0x604] ss:$24 sps:$4 sm:$0xff]   ;;  %v2731_v34 = vld [vmem:[#allocation5 + $0x398] ss:$24 sps:$4 sm:$0xff]  }
  0x4b   :  { %1843 = vmatpush2.bf16.msra.mxu0 %v2571_v38  ;;  %v2650_v38 = vld [vmem:[#allocation5 + $0x38] ss:$24 sps:$4 sm:$0xff]  }
  0x4c   :  { %1844 = vmatprep.subr.bf16.mxu0 %v2575_v39  ;;  %1884 = vmatpush2.bf16.msra.mxu1 %v2574_v40  ;;  %v2658_v39 = vld [vmem:[#allocation5 + $0xc] ss:$24 sps:$4 sm:$0xff]   ;;  %v2653_v40 = vld [vmem:[#allocation5 + $0x600] ss:$24 sps:$4 sm:$0xff]  }
  0x4d   :  { %1885 = vmatprep.subr.bf16.mxu1 %v2578_v41  ;;  %v2661_v41 = vld [vmem:[#allocation5 + $0x8d4] ss:$24 sps:$4 sm:$0xff]  }
  0x4f   :  { %1845 = vmatpush2.bf16.msra.mxu0 %v2577_v42  ;;  %v2656_v42 = vld [vmem:[#allocation5 + $0x8] ss:$24 sps:$4 sm:$0xff]  }
  0x50   :  { %1846 = vmatprep.subr.bf16.mxu0 %v2581_v43  ;;  %1886 = vmatpush2.bf16.msra.mxu1 %v2580_v44  ;;  %v2664_v43 = vld [vmem:[#allocation5 + $0x2dc] ss:$24 sps:$4 sm:$0xff]   ;;  %v2659_v44 = vld [vmem:[#allocation5 + $0x8d0] ss:$24 sps:$4 sm:$0xff]  }
  0x51   :  { %1887 = vmatprep.subr.bf16.mxu1 %v2584_v45  ;;  %v2667_v45 = vld [vmem:[#allocation5 + $0x8a4] ss:$24 sps:$4 sm:$0xff]  }
  0x53   :  { %1847 = vmatpush2.bf16.msra.mxu0 %v2583_v47  ;;  %v2670_v47 = vld [vmem:[#allocation5 + $0x2ac] ss:$24 sps:$4 sm:$0xff]  }
  0x54   :  { %1848 = vmatprep.subr.bf16.mxu0 %v2587_v49  ;;  %1888 = vmatpush2.bf16.msra.mxu1 %v2586_v51  ;;  %v2665_v49 = vld [vmem:[#allocation5 + $0x8a0] ss:$24 sps:$4 sm:$0xff]  }
  0x55   :  { %1889 = vmatprep.subr.bf16.mxu1 %v2590_v53  ;;  %v2668_v51 = vld [vmem:[#allocation5 + $0x2a8] ss:$24 sps:$4 sm:$0xff]   ;;  %v2676_v53 = vld [vmem:[#allocation5 + $0x27c] ss:$24 sps:$4 sm:$0xff]  }
  0x57   :  { %1849 = vmatpush2.bf16.msra.mxu0 %v2589_v54  ;;  %v2671_v54 = vld [vmem:[#allocation5 + $0x870] ss:$24 sps:$4 sm:$0xff]  }
  0x58   :  { %1850 = vmatprep.subr.bf16.mxu0 %v2593_v55  ;;  %1890 = vmatpush2.bf16.msra.mxu1 %v2592_v56  ;;  %v2679_v55 = vld [vmem:[#allocation5 + $0x844] ss:$24 sps:$4 sm:$0xff]   ;;  %v2674_v56 = vld [vmem:[#allocation5 + $0x278] ss:$24 sps:$4 sm:$0xff]  }
  0x59   :  { %1891 = vmatprep.subr.bf16.mxu1 %v2596_v57  ;;  %v2682_v57 = vld [vmem:[#allocation5 + $0x24c] ss:$24 sps:$4 sm:$0xff]  }
  0x5b   :  { %1851 = vmatpush2.bf16.msra.mxu0 %v2595_v58  ;;  %v2677_v58 = vld [vmem:[#allocation5 + $0x840] ss:$24 sps:$4 sm:$0xff]  }
  0x5c   :  { %1852 = vmatprep.subr.bf16.mxu0 %v2599_v59  ;;  %1892 = vmatpush2.bf16.msra.mxu1 %v2598_v60  ;;  %v2685_v59 = vld [vmem:[#allocation5 + $0x814] ss:$24 sps:$4 sm:$0xff]   ;;  %v2680_v60 = vld [vmem:[#allocation5 + $0x248] ss:$24 sps:$4 sm:$0xff]  }
  0x5d   :  { %1893 = vmatprep.subr.bf16.mxu1 %v2602_v61  ;;  %v2688_v61 = vld [vmem:[#allocation5 + $0x21c] ss:$24 sps:$4 sm:$0xff]  }
  0x5f   :  { %1853 = vmatpush2.bf16.msra.mxu0 %v2601_v62  ;;  %v2683_v62 = vld [vmem:[#allocation5 + $0x810] ss:$24 sps:$4 sm:$0xff]  }
  0x60   :  { %1854 = vmatprep.subr.bf16.mxu0 %v2605_v63  ;;  %1894 = vmatpush2.bf16.msra.mxu1 %v2604_v0  ;;  %v2691_v63 = vld [vmem:[#allocation5 + $0x7e4] ss:$24 sps:$4 sm:$0xff]   ;;  %v2686_v0 = vld [vmem:[#allocation5 + $0x218] ss:$24 sps:$4 sm:$0xff]  }
  0x61   :  { %1895 = vmatprep.subr.bf16.mxu1 %v2608_v2  ;;  %v2689_v2 = vld [vmem:[#allocation5 + $0x7e0] ss:$24 sps:$4 sm:$0xff]  }
  0x63   :  { %1855 = vmatpush2.bf16.msra.mxu0 %v2607_v1  ;;  %v2694_v1 = vld [vmem:[#allocation5 + $0x1ec] ss:$24 sps:$4 sm:$0xff]  }
  0x64   :  { %1906 = vmatprep.subr.bf16.mxu0 %v2613_v5  ;;  %1896 = vmatpush2.bf16.msra.mxu1 %v2610_v3  ;;  %v2697_v3 = vld [vmem:[#allocation5 + $0x7b4] ss:$24 sps:$4 sm:$0xff]  }
  0x65   :  { %1947 = vmatprep.subr.bf16.mxu1 %v2616_v8  ;;  %v2700_v5 = vld [vmem:[#allocation5 + $0x1bc] ss:$24 sps:$4 sm:$0xff]  }
  0x66   :  { %1857 = vmatmul.mubr.bf16.vlgmr.msra.gmra.mxu0 %v3086_v7  ;;  %v2703_v8 = vld [vmem:[#allocation5 + $0x784] ss:$24 sps:$4 sm:$0xff]  }
  0x67   :  { %1907 = vmatpush1.bf16.msra.mxu0 %v2611_v9  ;;  %1898 = vmatmul.mubr.bf16.vlgmr.msra.gmra.mxu1 %v3088_v10  ;;  %v2698_v9 = vld [vmem:[#allocation5 + $0x1b8] ss:$24 sps:$4 sm:$0xff]  }
  0x68   :  { %1908 = vmatprep.subr.bf16.mxu0 %v2619_v11  ;;  %1948 = vmatpush1.bf16.msra.mxu1 %v2614_v12  ;;  %v2701_v11 = vld [vmem:[#allocation5 + $0x780] ss:$24 sps:$4 sm:$0xff]   ;;  %v2706_v12 = vld [vmem:[#allocation5 + $0x18c] ss:$24 sps:$4 sm:$0xff]  }
  0x69   :  { %1979 = vmatprep.mubr.bf16.mxu1 %v3080_v48  ;;  %1949 = vmatprep.subr.bf16.mxu1 %v2622_v13  ;;  %v56_v13 = vld [vmem:[#allocation2 + $0x20] sm:$0xff] }
  0x6a   :  { %1938 = vmatprep.mubr.bf16.mxu0 %v3093_v36 }
  0x6b   :  { %1909 = vmatpush1.bf16.msra.mxu0 %v2617_v14  ;;  %v2709_v14 = vld [vmem:[#allocation5 + $0x45c] ss:$24 sps:$4 sm:$0xff]  }
  0x6c   :  { %1910 = vmatprep.subr.bf16.mxu0 %v2625_v15  ;;  %1950 = vmatpush1.bf16.msra.mxu1 %v2620_v16  ;;  %v2704_v15 = vld [vmem:[#allocation5 + $0x188] ss:$24 sps:$4 sm:$0xff]   ;;  %v3096_v16 = vpack.c.bf16 %v56_v13, %v56_v13 }
  0x6d   :  { %1951 = vmatprep.subr.bf16.mxu1 %v2628_v17  ;;  %v2712_v17 = vld [vmem:[#allocation5 + $0x75c] ss:$24 sps:$4 sm:$0xff]   ;;  %v2788_v13 = vld [vmem:[#allocation5 + $0x7e8] ss:$24 sps:$4 sm:$0xff]  }
  0x6f   :  { %1911 = vmatpush1.bf16.msra.mxu0 %v2623_v18  ;;  %v2707_v18 = vld [vmem:[#allocation5 + $0x458] ss:$24 sps:$4 sm:$0xff]  }
  0x70   :  { %1912 = vmatprep.subr.bf16.mxu0 %v2631_v19  ;;  %1952 = vmatpush1.bf16.msra.mxu1 %v2626_v20  ;;  %v2715_v19 = vld [vmem:[#allocation5 + $0x42c] ss:$24 sps:$4 sm:$0xff]   ;;  %v2710_v20 = vld [vmem:[#allocation5 + $0x758] ss:$24 sps:$4 sm:$0xff]  }
  0x71   :  { %1953 = vmatprep.subr.bf16.mxu1 %v2634_v21  ;;  %v2718_v21 = vld [vmem:[#allocation5 + $0x72c] ss:$24 sps:$4 sm:$0xff]  }
  0x73   :  { %1913 = vmatpush1.bf16.msra.mxu0 %v2629_v22  ;;  %v2713_v22 = vld [vmem:[#allocation5 + $0x428] ss:$24 sps:$4 sm:$0xff]  }
  0x74   :  { %1914 = vmatprep.subr.bf16.mxu0 %v2637_v23  ;;  %1954 = vmatpush1.bf16.msra.mxu1 %v2632_v24  ;;  %v2721_v23 = vld [vmem:[#allocation5 + $0x3fc] ss:$24 sps:$4 sm:$0xff]   ;;  %v2716_v24 = vld [vmem:[#allocation5 + $0x728] ss:$24 sps:$4 sm:$0xff]  }
  0x75   :  { %1955 = vmatprep.subr.bf16.mxu1 %v2640_v25  ;;  %v2724_v25 = vld [vmem:[#allocation5 + $0x6fc] ss:$24 sps:$4 sm:$0xff]  }
  0x77   :  { %1915 = vmatpush1.bf16.msra.mxu0 %v2635_v26  ;;  %v2719_v26 = vld [vmem:[#allocation5 + $0x3f8] ss:$24 sps:$4 sm:$0xff]  }
  0x78   :  { %1916 = vmatprep.subr.bf16.mxu0 %v2643_v27  ;;  %1956 = vmatpush1.bf16.msra.mxu1 %v2638_v28  ;;  %v2727_v27 = vld [vmem:[#allocation5 + $0x3cc] ss:$24 sps:$4 sm:$0xff]   ;;  %v2722_v28 = vld [vmem:[#allocation5 + $0x6f8] ss:$24 sps:$4 sm:$0xff]  }
  0x79   :  { %1957 = vmatprep.subr.bf16.mxu1 %v2646_v29  ;;  %v2730_v29 = vld [vmem:[#allocation5 + $0x6cc] ss:$24 sps:$4 sm:$0xff]  }
  0x7b   :  { %1917 = vmatpush1.bf16.msra.mxu0 %v2641_v30  ;;  %v2725_v30 = vld [vmem:[#allocation5 + $0x3c8] ss:$24 sps:$4 sm:$0xff]  }
  0x7c   :  { %1918 = vmatprep.subr.bf16.mxu0 %v2649_v31  ;;  %1958 = vmatpush1.bf16.msra.mxu1 %v2644_v32  ;;  %v2733_v31 = vld [vmem:[#allocation5 + $0x39c] ss:$24 sps:$4 sm:$0xff]   ;;  %v2728_v32 = vld [vmem:[#allocation5 + $0x6c8] ss:$24 sps:$4 sm:$0xff]  }
  0x7d   :  { %1959 = vmatprep.subr.bf16.mxu1 %v2652_v33  ;;  %v2736_v33 = vld [vmem:[#allocation5 + $0x69c] ss:$24 sps:$4 sm:$0xff]  }
  0x7f   :  { %1919 = vmatpush1.bf16.msra.mxu0 %v2647_v35  ;;  %v2739_v35 = vld [vmem:[#allocation5 + $0x36c] ss:$24 sps:$4 sm:$0xff]  }
  0x80   :  { %1920 = vmatprep.subr.bf16.mxu0 %v2655_v37  ;;  %1960 = vmatpush1.bf16.msra.mxu1 %v2650_v38  ;;  %v2734_v37 = vld [vmem:[#allocation5 + $0x698] ss:$24 sps:$4 sm:$0xff]   ;;  %v2742_v38 = vld [vmem:[#allocation5 + $0x66c] ss:$24 sps:$4 sm:$0xff]  }
  0x81   :  { %1961 = vmatprep.subr.bf16.mxu1 %v2658_v39  ;;  %v2737_v39 = vld [vmem:[#allocation5 + $0x368] ss:$24 sps:$4 sm:$0xff]  }
  0x83   :  { %1921 = vmatpush1.bf16.msra.mxu0 %v2653_v40  ;;  %v2745_v40 = vld [vmem:[#allocation5 + $0x33c] ss:$24 sps:$4 sm:$0xff]  }
  0x84   :  { %1922 = vmatprep.subr.bf16.mxu0 %v2661_v41  ;;  %1962 = vmatpush1.bf16.msra.mxu1 %v2656_v42  ;;  %v2740_v41 = vld [vmem:[#allocation5 + $0x668] ss:$24 sps:$4 sm:$0xff]   ;;  %v2748_v42 = vld [vmem:[#allocation5 + $0x63c] ss:$24 sps:$4 sm:$0xff]  }
  0x85   :  { %1963 = vmatprep.subr.bf16.mxu1 %v2664_v43  ;;  %v2743_v43 = vld [vmem:[#allocation5 + $0x338] ss:$24 sps:$4 sm:$0xff]  }
  0x87   :  { %1923 = vmatpush2.bf16.msra.mxu0 %v2659_v44  ;;  %v2751_v44 = vld [vmem:[#allocation5 + $0x30c] ss:$24 sps:$4 sm:$0xff]  }
  0x88   :  { %1924 = vmatprep.subr.bf16.mxu0 %v2667_v45  ;;  %1964 = vmatpush2.bf16.msra.mxu1 %v2662_v46  ;;  %v2746_v45 = vld [vmem:[#allocation5 + $0x638] ss:$24 sps:$4 sm:$0xff]   ;;  %v2754_v46 = vld [vmem:[#allocation5 + $0x60c] ss:$24 sps:$4 sm:$0xff]  }
  0x89   :  { %1965 = vmatprep.subr.bf16.mxu1 %v2670_v47  ;;  %v2749_v47 = vld [vmem:[#allocation5 + $0x308] ss:$24 sps:$4 sm:$0xff]  }
  0x8b   :  { %1925 = vmatpush2.bf16.msra.mxu0 %v2665_v49  ;;  %v2757_v49 = vld [vmem:[#allocation5 + $0x5dc] ss:$24 sps:$4 sm:$0xff]  }
  0x8c   :  { %1926 = vmatprep.subr.bf16.mxu0 %v2673_v50  ;;  %1966 = vmatpush2.bf16.msra.mxu1 %v2668_v51  ;;  %v2752_v50 = vld [vmem:[#allocation5 + $0x608] ss:$24 sps:$4 sm:$0xff]   ;;  %v2760_v51 = vld [vmem:[#allocation5 + $0x8dc] ss:$24 sps:$4 sm:$0xff]  }
  0x8d   :  { %1967 = vmatprep.subr.bf16.mxu1 %v2676_v53  ;;  %v2755_v53 = vld [vmem:[#allocation5 + $0x5d8] ss:$24 sps:$4 sm:$0xff]  }
  0x8f   :  { %1927 = vmatpush2.bf16.msra.mxu0 %v2671_v54  ;;  %v2763_v54 = vld [vmem:[#allocation5 + $0x5ac] ss:$24 sps:$4 sm:$0xff]  }
  0x90   :  { %1928 = vmatprep.subr.bf16.mxu0 %v2679_v55  ;;  %1968 = vmatpush2.bf16.msra.mxu1 %v2674_v56  ;;  %v2758_v55 = vld [vmem:[#allocation5 + $0x8d8] ss:$24 sps:$4 sm:$0xff]   ;;  %v2766_v56 = vld [vmem:[#allocation5 + $0x8ac] ss:$24 sps:$4 sm:$0xff]  }
  0x91   :  { %1969 = vmatprep.subr.bf16.mxu1 %v2682_v57  ;;  %v2761_v57 = vld [vmem:[#allocation5 + $0x5a8] ss:$24 sps:$4 sm:$0xff]  }
  0x93   :  { %1929 = vmatpush2.bf16.msra.mxu0 %v2677_v58  ;;  %v2769_v58 = vld [vmem:[#allocation5 + $0x57c] ss:$24 sps:$4 sm:$0xff]  }
  0x94   :  { %1930 = vmatprep.subr.bf16.mxu0 %v2685_v59  ;;  %1970 = vmatpush2.bf16.msra.mxu1 %v2680_v60  ;;  %v2764_v59 = vld [vmem:[#allocation5 + $0x8a8] ss:$24 sps:$4 sm:$0xff]   ;;  %v2772_v60 = vld [vmem:[#allocation5 + $0x87c] ss:$24 sps:$4 sm:$0xff]  }
  0x95   :  { %1971 = vmatprep.subr.bf16.mxu1 %v2688_v61  ;;  %v2767_v61 = vld [vmem:[#allocation5 + $0x578] ss:$24 sps:$4 sm:$0xff]  }
  0x97   :  { %1931 = vmatpush2.bf16.msra.mxu0 %v2683_v62  ;;  %v2775_v62 = vld [vmem:[#allocation5 + $0x54c] ss:$24 sps:$4 sm:$0xff]  }
  0x98   :  { %1932 = vmatprep.subr.bf16.mxu0 %v2691_v63  ;;  %1972 = vmatpush2.bf16.msra.mxu1 %v2686_v0  ;;  %v2770_v63 = vld [vmem:[#allocation5 + $0x878] ss:$24 sps:$4 sm:$0xff]   ;;  %v2778_v0 = vld [vmem:[#allocation5 + $0x84c] ss:$24 sps:$4 sm:$0xff]  }
  0x99   :  { %1973 = vmatprep.subr.bf16.mxu1 %v2694_v1  ;;  %v2773_v1 = vld [vmem:[#allocation5 + $0x548] ss:$24 sps:$4 sm:$0xff]  }
  0x9b   :  { %1933 = vmatpush2.bf16.msra.mxu0 %v2689_v2  ;;  %v2781_v2 = vld [vmem:[#allocation5 + $0x51c] ss:$24 sps:$4 sm:$0xff]  }
  0x9c   :  { %1934 = vmatprep.subr.bf16.mxu0 %v2697_v3  ;;  %1974 = vmatpush2.bf16.msra.mxu1 %v2692_v4  ;;  %v2776_v3 = vld [vmem:[#allocation5 + $0x848] ss:$24 sps:$4 sm:$0xff]   ;;  %v2784_v4 = vld [vmem:[#allocation5 + $0x81c] ss:$24 sps:$4 sm:$0xff]  }
  0x9d   :  { %1975 = vmatprep.subr.bf16.mxu1 %v2700_v5  ;;  %v2779_v5 = vld [vmem:[#allocation5 + $0x518] ss:$24 sps:$4 sm:$0xff]  }
  0x9f   :  { %1935 = vmatpush2.bf16.msra.mxu0 %v2695_v6  ;;  %v2787_v6 = vld [vmem:[#allocation5 + $0x4ec] ss:$24 sps:$4 sm:$0xff]  }
  0xa0   :  { %1936 = vmatprep.subr.bf16.mxu0 %v2703_v8  ;;  %1976 = vmatpush2.bf16.msra.mxu1 %v2698_v9  ;;  %v2782_v8 = vld [vmem:[#allocation5 + $0x818] ss:$24 sps:$4 sm:$0xff]   ;;  %v2790_v9 = vld [vmem:[#allocation5 + $0x7ec] ss:$24 sps:$4 sm:$0xff]  }
  0xa1   :  { %1977 = vmatprep.subr.bf16.mxu1 %v2706_v12  ;;  %v2793_v12 = vld [vmem:[#allocation5 + $0x4bc] ss:$24 sps:$4 sm:$0xff]  }
  0xa3   :  { %1937 = vmatpush2.bf16.msra.mxu0 %v2701_v11  ;;  %v2785_v11 = vld [vmem:[#allocation5 + $0x4e8] ss:$24 sps:$4 sm:$0xff]  }
  0xa4   :  { %1988 = vmatprep.subr.bf16.mxu0 %v2709_v14  ;;  %1978 = vmatpush2.bf16.msra.mxu1 %v2704_v15  ;;  %v2796_v14 = vld [vmem:[#allocation5 + $0x7bc] ss:$24 sps:$4 sm:$0xff]   ;;  %v2791_v15 = vld [vmem:[#allocation5 + $0x4b8] ss:$24 sps:$4 sm:$0xff]  }
  0xa5   :  { %2029 = vmatprep.subr.bf16.mxu1 %v2712_v17  ;;  %v2799_v17 = vld [vmem:[#allocation5 + $0x48c] ss:$24 sps:$4 sm:$0xff]  }
  0xa6   :  { %1939 = vmatmul.mubr.bf16.vlgmr.msra.gmra.mxu0 %v3096_v16 }
  0xa7   :  { %1989 = vmatpush1.bf16.msra.mxu0 %v2707_v18  ;;  %2020 = vmatprep.mubr.bf16.mxu0 %v3083_v52  ;;  %v2794_v18 = vld [vmem:[#allocation5 + $0x7b8] ss:$24 sps:$4 sm:$0xff]  }
  0xa8   :  { %1980 = vmatmul.mubr.bf16.vlgmr.msra.gmra.mxu1 %v3086_v7  ;;  %1990 = vmatprep.subr.bf16.mxu0 %v2715_v19  ;;  %v2802_v19 = vld [vmem:[#allocation5 + $0x78c] ss:$24 sps:$4 sm:$0xff]  }
  0xa9   :  { %2030 = vmatpush1.bf16.msra.mxu1 %v2710_v20  ;;  %2061 = vmatprep.mubr.bf16.mxu1 %v3093_v36  ;;  %v2797_v20 = vld [vmem:[#allocation5 + $0x488] ss:$24 sps:$4 sm:$0xff]  }
  0xaa   :  { %2031 = vmatprep.subr.bf16.mxu1 %v2718_v21  ;;  %v2805_v21 = vld [vmem:[#allocation5 + $0x164] ss:$24 sps:$4 sm:$0xff]  }
  0xab   :  { %1991 = vmatpush1.bf16.msra.mxu0 %v2713_v22  ;;  %v2800_v22 = vld [vmem:[#allocation5 + $0x788] ss:$24 sps:$4 sm:$0xff]  }
  0xac   :  { %1992 = vmatprep.subr.bf16.mxu0 %v2721_v23  ;;  %v2808_v23 = vld [vmem:[#allocation5 + $0x464] ss:$24 sps:$4 sm:$0xff]  }
  0xad   :  { %2032 = vmatpush1.bf16.msra.mxu1 %v2716_v24  ;;  %v2803_v24 = vld [vmem:[#allocation5 + $0x160] ss:$24 sps:$4 sm:$0xff]  }
  0xae   :  { %2033 = vmatprep.subr.bf16.mxu1 %v2724_v25  ;;  %v2811_v25 = vld [vmem:[#allocation5 + $0x134] ss:$24 sps:$4 sm:$0xff]  }
  0xaf   :  { %1993 = vmatpush1.bf16.msra.mxu0 %v2719_v26  ;;  %v2806_v26 = vld [vmem:[#allocation5 + $0x460] ss:$24 sps:$4 sm:$0xff]  }
  0xb0   :  { %1994 = vmatprep.subr.bf16.mxu0 %v2727_v27  ;;  %v2814_v27 = vld [vmem:[#allocation5 + $0x434] ss:$24 sps:$4 sm:$0xff]  }
  0xb1   :  { %2034 = vmatpush1.bf16.msra.mxu1 %v2722_v28  ;;  %v2809_v28 = vld [vmem:[#allocation5 + $0x130] ss:$24 sps:$4 sm:$0xff]  }
  0xb2   :  { %2035 = vmatprep.subr.bf16.mxu1 %v2730_v29  ;;  %v2817_v29 = vld [vmem:[#allocation5 + $0x104] ss:$24 sps:$4 sm:$0xff]  }
  0xb3   :  { %1995 = vmatpush1.bf16.msra.mxu0 %v2725_v30  ;;  %v2812_v30 = vld [vmem:[#allocation5 + $0x430] ss:$24 sps:$4 sm:$0xff]  }
  0xb4   :  { %1996 = vmatprep.subr.bf16.mxu0 %v2733_v31  ;;  %v2820_v31 = vld [vmem:[#allocation5 + $0x404] ss:$24 sps:$4 sm:$0xff]  }
  0xb5   :  { %2036 = vmatpush1.bf16.msra.mxu1 %v2728_v32  ;;  %v2815_v32 = vld [vmem:[#allocation5 + $0x100] ss:$24 sps:$4 sm:$0xff]  }
  0xb6   :  { %2037 = vmatprep.subr.bf16.mxu1 %v2736_v33  ;;  %v2823_v33 = vld [vmem:[#allocation5 + $0xd4] ss:$24 sps:$4 sm:$0xff]  }
  0xb7   :  { %1997 = vmatpush1.bf16.msra.mxu0 %v2731_v34  ;;  %v2818_v34 = vld [vmem:[#allocation5 + $0x400] ss:$24 sps:$4 sm:$0xff]  }
  0xb8   :  { %1998 = vmatprep.subr.bf16.mxu0 %v2739_v35  ;;  %v2826_v35 = vld [vmem:[#allocation5 + $0x3d4] ss:$24 sps:$4 sm:$0xff]  }
  0xb9   :  { %2038 = vmatpush1.bf16.msra.mxu1 %v2734_v37  ;;  %v2829_v37 = vld [vmem:[#allocation5 + $0xa4] ss:$24 sps:$4 sm:$0xff]  }
  0xba   :  { %2039 = vmatprep.subr.bf16.mxu1 %v2742_v38  ;;  %v2824_v38 = vld [vmem:[#allocation5 + $0x3d0] ss:$24 sps:$4 sm:$0xff]  }
  0xbb   :  { %1999 = vmatpush1.bf16.msra.mxu0 %v2737_v39  ;;  %v2832_v39 = vld [vmem:[#allocation5 + $0x3a4] ss:$24 sps:$4 sm:$0xff]  }
  0xbc   :  { %2000 = vmatprep.subr.bf16.mxu0 %v2745_v40  ;;  %v2835_v40 = vld [vmem:[#allocation5 + $0x74] ss:$24 sps:$4 sm:$0xff]  }
  0xbd   :  { %2040 = vmatpush1.bf16.msra.mxu1 %v2740_v41  ;;  %v2830_v41 = vld [vmem:[#allocation5 + $0x3a0] ss:$24 sps:$4 sm:$0xff]  }
  0xbe   :  { %2041 = vmatprep.subr.bf16.mxu1 %v2748_v42  ;;  %v2838_v42 = vld [vmem:[#allocation5 + $0x374] ss:$24 sps:$4 sm:$0xff]  }
  0xbf   :  { %2001 = vmatpush1.bf16.msra.mxu0 %v2743_v43  ;;  %v2833_v43 = vld [vmem:[#allocation5 + $0x70] ss:$24 sps:$4 sm:$0xff]  }
  0xc0   :  { %2002 = vmatprep.subr.bf16.mxu0 %v2751_v44  ;;  %v2841_v44 = vld [vmem:[#allocation5 + $0x44] ss:$24 sps:$4 sm:$0xff]  }
  0xc1   :  { %2042 = vmatpush1.bf16.msra.mxu1 %v2746_v45  ;;  %v2836_v45 = vld [vmem:[#allocation5 + $0x370] ss:$24 sps:$4 sm:$0xff]  }
  0xc2   :  { %2043 = vmatprep.subr.bf16.mxu1 %v2754_v46  ;;  %v2844_v46 = vld [vmem:[#allocation5 + $0x344] ss:$24 sps:$4 sm:$0xff]  }
  0xc3   :  { %2003 = vmatpush1.bf16.msra.mxu0 %v2749_v47  ;;  %v2839_v47 = vld [vmem:[#allocation5 + $0x40] ss:$24 sps:$4 sm:$0xff]  }
  0xc4   :  { %2004 = vmatprep.subr.bf16.mxu0 %v2757_v49  ;;  %v2847_v49 = vld [vmem:[#allocation5 + $0x14] ss:$24 sps:$4 sm:$0xff]  }
  0xc5   :  { %2044 = vmatpush1.bf16.msra.mxu1 %v2752_v50  ;;  %v2842_v50 = vld [vmem:[#allocation5 + $0x340] ss:$24 sps:$4 sm:$0xff]  }
  0xc6   :  { %2045 = vmatprep.subr.bf16.mxu1 %v2760_v51  ;;  %v2850_v51 = vld [vmem:[#allocation5 + $0x314] ss:$24 sps:$4 sm:$0xff]  }
  0xc7   :  { %2005 = vmatpush2.bf16.msra.mxu0 %v2755_v53  ;;  %v2845_v53 = vld [vmem:[#allocation5 + $0x10] ss:$24 sps:$4 sm:$0xff]  }
  0xc8   :  { %2006 = vmatprep.subr.bf16.mxu0 %v2763_v54  ;;  %v2853_v54 = vld [vmem:[#allocation5 + $0x2e4] ss:$24 sps:$4 sm:$0xff]  }
  0xc9   :  { %2046 = vmatpush2.bf16.msra.mxu1 %v2758_v55  ;;  %v2848_v55 = vld [vmem:[#allocation5 + $0x310] ss:$24 sps:$4 sm:$0xff]  }
  0xca   :  { %2047 = vmatprep.subr.bf16.mxu1 %v2766_v56  ;;  %v2856_v56 = vld [vmem:[#allocation5 + $0x5e4] ss:$24 sps:$4 sm:$0xff]  }
  0xcb   :  { %2007 = vmatpush2.bf16.msra.mxu0 %v2761_v57  ;;  %v2851_v57 = vld [vmem:[#allocation5 + $0x2e0] ss:$24 sps:$4 sm:$0xff]  }
  0xcc   :  { %2008 = vmatprep.subr.bf16.mxu0 %v2769_v58  ;;  %v2859_v58 = vld [vmem:[#allocation5 + $0x2b4] ss:$24 sps:$4 sm:$0xff]  }
  0xcd   :  { %2048 = vmatpush2.bf16.msra.mxu1 %v2764_v59  ;;  %v2854_v59 = vld [vmem:[#allocation5 + $0x5e0] ss:$24 sps:$4 sm:$0xff]  }
  0xce   :  { %2049 = vmatprep.subr.bf16.mxu1 %v2772_v60  ;;  %v2862_v60 = vld [vmem:[#allocation5 + $0x5b4] ss:$24 sps:$4 sm:$0xff]  }
  0xcf   :  { %2009 = vmatpush2.bf16.msra.mxu0 %v2767_v61  ;;  %v2857_v61 = vld [vmem:[#allocation5 + $0x2b0] ss:$24 sps:$4 sm:$0xff]  }
  0xd0   :  { %2010 = vmatprep.subr.bf16.mxu0 %v2775_v62  ;;  %v2865_v62 = vld [vmem:[#allocation5 + $0x284] ss:$24 sps:$4 sm:$0xff]  }
  0xd1   :  { %2050 = vmatpush2.bf16.msra.mxu1 %v2770_v63  ;;  %v2860_v63 = vld [vmem:[#allocation5 + $0x5b0] ss:$24 sps:$4 sm:$0xff]  }
  0xd2   :  { %2051 = vmatprep.subr.bf16.mxu1 %v2778_v0  ;;  %v2868_v0 = vld [vmem:[#allocation5 + $0x584] ss:$24 sps:$4 sm:$0xff]  }
  0xd3   :  { %2011 = vmatpush2.bf16.msra.mxu0 %v2773_v1  ;;  %v2863_v1 = vld [vmem:[#allocation5 + $0x280] ss:$24 sps:$4 sm:$0xff]  }
  0xd4   :  { %2012 = vmatprep.subr.bf16.mxu0 %v2781_v2  ;;  %v2871_v2 = vld [vmem:[#allocation5 + $0x254] ss:$24 sps:$4 sm:$0xff]  }
  0xd5   :  { %2052 = vmatpush2.bf16.msra.mxu1 %v2776_v3  ;;  %v2866_v3 = vld [vmem:[#allocation5 + $0x580] ss:$24 sps:$4 sm:$0xff]  }
  0xd6   :  { %2053 = vmatprep.subr.bf16.mxu1 %v2784_v4  ;;  %v2874_v4 = vld [vmem:[#allocation5 + $0x554] ss:$24 sps:$4 sm:$0xff]  }
  0xd7   :  { %2013 = vmatpush2.bf16.msra.mxu0 %v2779_v5  ;;  %v2869_v5 = vld [vmem:[#allocation5 + $0x250] ss:$24 sps:$4 sm:$0xff]  }
  0xd8   :  { %2014 = vmatprep.subr.bf16.mxu0 %v2787_v6  ;;  %v2877_v6 = vld [vmem:[#allocation5 + $0x224] ss:$24 sps:$4 sm:$0xff]  }
  0xd9   :  { %2054 = vmatpush2.bf16.msra.mxu1 %v2782_v8  ;;  %v2872_v8 = vld [vmem:[#allocation5 + $0x550] ss:$24 sps:$4 sm:$0xff]  }
  0xda   :  { %2055 = vmatprep.subr.bf16.mxu1 %v2790_v9  ;;  %v2880_v9 = vld [vmem:[#allocation5 + $0x524] ss:$24 sps:$4 sm:$0xff]  }
  0xdb   :  { %2015 = vmatpush2.bf16.msra.mxu0 %v2785_v11  ;;  %v2875_v11 = vld [vmem:[#allocation5 + $0x220] ss:$24 sps:$4 sm:$0xff]  }
  0xdc   :  { %2016 = vmatprep.subr.bf16.mxu0 %v2793_v12  ;;  %v2883_v12 = vld [vmem:[#allocation5 + $0x1f4] ss:$24 sps:$4 sm:$0xff]  }
  0xdd   :  { %2056 = vmatpush2.bf16.msra.mxu1 %v2788_v13  ;;  %v2878_v13 = vld [vmem:[#allocation5 + $0x520] ss:$24 sps:$4 sm:$0xff]  }
  0xde   :  { %2057 = vmatprep.subr.bf16.mxu1 %v2796_v14  ;;  %v2886_v14 = vld [vmem:[#allocation5 + $0x4f4] ss:$24 sps:$4 sm:$0xff]  }
  0xdf   :  { %2017 = vmatpush2.bf16.msra.mxu0 %v2791_v15  ;;  %v2881_v15 = vld [vmem:[#allocation5 + $0x1f0] ss:$24 sps:$4 sm:$0xff]  }
  0xe0   :  { %2018 = vmatprep.subr.bf16.mxu0 %v2799_v17  ;;  %v2889_v17 = vld [vmem:[#allocation5 + $0x1c4] ss:$24 sps:$4 sm:$0xff]  }
  0xe1   :  { %2058 = vmatpush2.bf16.msra.mxu1 %v2794_v18  ;;  %v2884_v18 = vld [vmem:[#allocation5 + $0x4f0] ss:$24 sps:$4 sm:$0xff]  }
  0xe2   :  { %2059 = vmatprep.subr.bf16.mxu1 %v2802_v19  ;;  %v2892_v19 = vld [vmem:[#allocation5 + $0x4c4] ss:$24 sps:$4 sm:$0xff]  }
  0xe3   :  { %2019 = vmatpush2.bf16.msra.mxu0 %v2797_v20  ;;  %v2887_v20 = vld [vmem:[#allocation5 + $0x1c0] ss:$24 sps:$4 sm:$0xff]  }
  0xe4   :  { %2070 = vmatprep.subr.bf16.mxu0 %v2805_v21  ;;  %v2895_v21 = vld [vmem:[#allocation5 + $0x194] ss:$24 sps:$4 sm:$0xff]  }
  0xe5   :  { %2060 = vmatpush2.bf16.msra.mxu1 %v2800_v22  ;;  %v2890_v22 = vld [vmem:[#allocation5 + $0x4c0] ss:$24 sps:$4 sm:$0xff]  }
  0xe6   :  { %2021 = vmatmul.mubr.bf16.vlgmr.msra.gmra.mxu0 %v3088_v10  ;;  %2111 = vmatprep.subr.bf16.mxu1 %v2808_v23  ;;  %v2898_v23 = vld [vmem:[#allocation5 + $0x494] ss:$24 sps:$4 sm:$0xff]  }
  0xe7   :  { %2071 = vmatpush1.bf16.msra.mxu0 %v2803_v24  ;;  %2102 = vmatprep.mubr.bf16.mxu0 %v3080_v48  ;;  %v2821_v48 = vld [vmem:[#allocation5 + $0xd0] ss:$24 sps:$4 sm:$0xff]  }
  0xe8   :  { %2062 = vmatmul.mubr.bf16.vlgmr.msra.gmra.mxu1 %v3096_v16  ;;  %2072 = vmatprep.subr.bf16.mxu0 %v2811_v25  ;;  %v2893_v24 = vld [vmem:[#allocation5 + $0x190] ss:$24 sps:$4 sm:$0xff]   ;;  %v2901_v25 = vld [vmem:[#allocation5 + $0x764] ss:$24 sps:$4 sm:$0xff]  }
  0xe9   :  { %2112 = vmatpush1.bf16.msra.mxu1 %v2806_v26  ;;  %2143 = vmatprep.mubr.bf16.mxu1 %v3083_v52  ;;  %v2827_v52 = vld [vmem:[#allocation5 + $0xa0] ss:$24 sps:$4 sm:$0xff]   ;;  %v2896_v26 = vld [vmem:[#allocation5 + $0x490] ss:$24 sps:$4 sm:$0xff]  }
  0xea   :  { %2113 = vmatprep.subr.bf16.mxu1 %v2814_v27  ;;  %v2899_v27 = vld [vmem:[#allocation5 + $0x760] ss:$24 sps:$4 sm:$0xff]  }
  0xeb   :  { %2073 = vmatpush1.bf16.msra.mxu0 %v2809_v28  ;;  %v2904_v28 = vld [vmem:[#allocation5 + $0x734] ss:$24 sps:$4 sm:$0xff]  }
  0xec   :  { %2074 = vmatprep.subr.bf16.mxu0 %v2817_v29 }
  0xed   :  { %2114 = vmatpush1.bf16.msra.mxu1 %v2812_v30  ;;  %v2902_v30 = vld [vmem:[#allocation5 + $0x730] ss:$24 sps:$4 sm:$0xff]  }
  0xee   :  { %2115 = vmatprep.subr.bf16.mxu1 %v2820_v31 }
  0xef   :  { %2075 = vmatpush1.bf16.msra.mxu0 %v2815_v32 }
  0xf0   :  { %2076 = vmatprep.subr.bf16.mxu0 %v2823_v33  ;;  %v2907_v33 = vld [vmem:[#allocation5 + $0x704] ss:$24 sps:$4 sm:$0xff]  }
  0xf1   :  { %2116 = vmatpush1.bf16.msra.mxu1 %v2818_v34 }
  0xf2   :  { %2117 = vmatprep.subr.bf16.mxu1 %v2826_v35 }
  0xf3   :  { %2077 = vmatpush1.bf16.msra.mxu0 %v2821_v48  ;;  %v2905_v48 = vld [vmem:[#allocation5 + $0x700] ss:$24 sps:$4 sm:$0xff]  }
  0xf4   :  { %2078 = vmatprep.subr.bf16.mxu0 %v2829_v37 }
  0xf5   :  { %2118 = vmatpush1.bf16.msra.mxu1 %v2824_v38 }
  0xf6   :  { %2119 = vmatprep.subr.bf16.mxu1 %v2832_v39 }
  0xf7   :  { %2079 = vmatpush1.bf16.msra.mxu0 %v2827_v52  ;;  %v2913_v52 = vld [vmem:[#allocation5 + $0x6a4] ss:$24 sps:$4 sm:$0xff]  }
  0xf8   :  { %2080 = vmatprep.subr.bf16.mxu0 %v2835_v40  ;;  %v2911_v40 = vld [vmem:[#allocation5 + $0x6a0] ss:$24 sps:$4 sm:$0xff]  }
  0xf9   :  { %2120 = vmatpush1.bf16.msra.mxu1 %v2830_v41  ;;  %v2914_v41 = vld [vmem:[#allocation5 + $0x670] ss:$24 sps:$4 sm:$0xff]  }
  0xfa   :  { %2121 = vmatprep.subr.bf16.mxu1 %v2838_v42  ;;  %v2919_v42 = vld [vmem:[#allocation5 + $0x644] ss:$24 sps:$4 sm:$0xff]  }
  0xfb   :  { %2081 = vmatpush1.bf16.msra.mxu0 %v2833_v43  ;;  %v2917_v43 = vld [vmem:[#allocation5 + $0x640] ss:$24 sps:$4 sm:$0xff]  }
  0xfc   :  { %2082 = vmatprep.subr.bf16.mxu0 %v2841_v44  ;;  %v2922_v44 = vld [vmem:[#allocation5 + $0x614] ss:$24 sps:$4 sm:$0xff]  }
  0xfd   :  { %2122 = vmatpush1.bf16.msra.mxu1 %v2836_v45  ;;  %v2920_v45 = vld [vmem:[#allocation5 + $0x610] ss:$24 sps:$4 sm:$0xff]  }
  0xfe   :  { %2123 = vmatprep.subr.bf16.mxu1 %v2844_v46  ;;  %v2925_v46 = vld [vmem:[#allocation5 + $0x8e4] ss:$24 sps:$4 sm:$0xff]  }
  0xff   :  { %2083 = vmatpush1.bf16.msra.mxu0 %v2839_v47  ;;  %v2923_v47 = vld [vmem:[#allocation5 + $0x8e0] ss:$24 sps:$4 sm:$0xff]  }
 0x100   :  { %2084 = vmatprep.subr.bf16.mxu0 %v2847_v49  ;;  %v2928_v49 = vld [vmem:[#allocation5 + $0x8b4] ss:$24 sps:$4 sm:$0xff]  }
 0x101   :  { %2124 = vmatpush1.bf16.msra.mxu1 %v2842_v50  ;;  %v2926_v50 = vld [vmem:[#allocation5 + $0x8b0] ss:$24 sps:$4 sm:$0xff]  }
 0x102   :  { %2125 = vmatprep.subr.bf16.mxu1 %v2850_v51  ;;  %v2931_v51 = vld [vmem:[#allocation5 + $0x884] ss:$24 sps:$4 sm:$0xff]  }
 0x103   :  { %2085 = vmatpush1.bf16.msra.mxu0 %v2845_v53  ;;  %v2929_v53 = vld [vmem:[#allocation5 + $0x880] ss:$24 sps:$4 sm:$0xff]  }
 0x104   :  { %2086 = vmatprep.subr.bf16.mxu0 %v2853_v54  ;;  %v2934_v54 = vld [vmem:[#allocation5 + $0x854] ss:$24 sps:$4 sm:$0xff]  }
 0x105   :  { %2126 = vmatpush1.bf16.msra.mxu1 %v2848_v55  ;;  %v2932_v55 = vld [vmem:[#allocation5 + $0x850] ss:$24 sps:$4 sm:$0xff]  }
 0x106   :  { %2127 = vmatprep.subr.bf16.mxu1 %v2856_v56  ;;  %v2937_v56 = vld [vmem:[#allocation5 + $0x824] ss:$24 sps:$4 sm:$0xff]  }
 0x107   :  { %2087 = vmatpush2.bf16.msra.mxu0 %v2851_v57  ;;  %v354_v57 = vlaneseq }
 0x108   :  { %2088 = vmatprep.subr.bf16.mxu0 %v2859_v58  ;;  %v2935_v58 = vld [vmem:[#allocation5 + $0x820] ss:$24 sps:$4 sm:$0xff]  }
 0x109   :  { %2128 = vmatpush2.bf16.msra.mxu1 %v2854_v59  ;;  %v2940_v59 = vld [vmem:[#allocation5 + $0x7f4] ss:$24 sps:$4 sm:$0xff]  }
 0x10a   :  { %2129 = vmatprep.subr.bf16.mxu1 %v2862_v60  ;;  %v3117_v60 = vshrl.u32 %v354_v57, 7 }
 0x10b   :  { %2089 = vmatpush2.bf16.msra.mxu0 %v2857_v61  ;;  %v2938_v61 = vld [vmem:[#allocation5 + $0x7f0] ss:$24 sps:$4 sm:$0xff]  }
 0x10c   :  { %2090 = vmatprep.subr.bf16.mxu0 %v2865_v62  ;;  %v2943_v62 = vld [vmem:[#allocation5 + $0x7c4] ss:$24 sps:$4 sm:$0xff]  }
 0x10d   :  { %2130 = vmatpush2.bf16.msra.mxu1 %v2860_v63  ;;  %v356_v63 = vsub.s32 0, %v3117_v60 }
 0x10e   :  { %2131 = vmatprep.subr.bf16.mxu1 %v2868_v0  ;;  %v3120_v0 = vld [vmem:[#allocation7] sm:$0x3f] }
 0x10f   :  { %2091 = vmatpush2.bf16.msra.mxu0 %v2863_v1  ;;  %v360_v1 = vsub.s32 1, %v3117_v60 }
 0x110   :  { %2092 = vmatprep.subr.bf16.mxu0 %v2871_v2  ;;  %v2941_v2 = vld [vmem:[#allocation5 + $0x7c0] ss:$24 sps:$4 sm:$0xff]  }
 0x111   :  { %2132 = vmatpush2.bf16.msra.mxu1 %v2866_v3  ;;  %v2946_v3 = vld [vmem:[#allocation5 + $0x794] ss:$24 sps:$4 sm:$0xff]  }
 0x112   :  { %2133 = vmatprep.subr.bf16.mxu1 %v2874_v4  ;;  %v357_v4 = vrot.slane %v3120_v0, %v356_v63 }
 0x113   :  { %2093 = vmatpush2.bf16.msra.mxu0 %v2869_v5  ;;  %v361_v5 = vrot.slane %v3120_v0, %v360_v1 }
 0x114   :  { %2094 = vmatprep.subr.bf16.mxu0 %v2877_v6  ;;  %v2944_v6 = vld [vmem:[#allocation5 + $0x790] ss:$24 sps:$4 sm:$0xff]  }
 0x115   :  { %2134 = vmatpush2.bf16.msra.mxu1 %v2872_v8 }
 0x116   :  { %2135 = vmatprep.subr.bf16.mxu1 %v2880_v9 }
 0x117   :  { %2095 = vmatpush2.bf16.msra.mxu0 %v2875_v11 }
 0x118   :  { %2096 = vmatprep.subr.bf16.mxu0 %v2883_v12 }
 0x119   :  { %2136 = vmatpush2.bf16.msra.mxu1 %v2878_v13 }
 0x11a   :  { %2137 = vmatprep.subr.bf16.mxu1 %v2886_v14 }
 0x11b   :  { %2097 = vmatpush2.bf16.msra.mxu0 %v2881_v15 }
 0x11c   :  { %2098 = vmatprep.subr.bf16.mxu0 %v2889_v17 }
 0x11d   :  { %2138 = vmatpush2.bf16.msra.mxu1 %v2884_v18 }
 0x11e   :  { %2139 = vmatprep.subr.bf16.mxu1 %v2892_v19 }
 0x11f   :  { %2099 = vmatpush2.bf16.msra.mxu0 %v2887_v20 }
 0x120   :  { %2100 = vmatprep.subr.bf16.mxu0 %v2895_v21 }
 0x121   :  { %2140 = vmatpush2.bf16.msra.mxu1 %v2890_v22 }
 0x122   :  { %2141 = vmatprep.subr.bf16.mxu1 %v2898_v23 }
 0x123   :  { %2101 = vmatpush2.bf16.msra.mxu0 %v2893_v24 }
 0x124   :  { %2152 = vmatprep.subr.bf16.mxu0 %v2901_v25 }
 0x125   :  { %2142 = vmatpush2.bf16.msra.mxu1 %v2896_v26  ;;  %v364_v26 = vsub.s32 2, %v3117_v60 }
 0x126   :  { %v3106_v29 = vpop.f32.mrf.mxu0  ;;  %2103 = vmatmul.mubr.bf16.vlgmr.msra.gmra.mxu0 %v3086_v7  ;;  %v2910_v7 = vld [vmem:[#allocation5 + $0x6d4] ss:$24 sps:$4 sm:$0xff]  }
 0x127   :  { %2153 = vmatpush1.bf16.msra.mxu0 %v2899_v27  ;;  %2184 = vmatprep.mubr.bf16.mxu0 %v3093_v36  ;;  %v3112_v32 = vpop.f32.mrf.mxu1  ;;  %v2908_v36 = vld [vmem:[#allocation5 + $0x6d0] ss:$24 sps:$4 sm:$0xff]   ;;  %v1859_v8 = vadd.f32 %v3106_v29, %v357_v4  ;;  %v365_v27 = vrot.slane %v3120_v0, %v364_v26 }
 0x128   :  { %v3110_v31 = vpop.f32.mrf.mxu0  ;;  %2144 = vmatmul.mubr.bf16.vlgmr.msra.gmra.mxu1 %v3088_v10  ;;  %2154 = vmatprep.subr.bf16.mxu0 %v2904_v28  ;;  %v2916_v10 = vld [vmem:[#allocation5 + $0x674] ss:$24 sps:$4 sm:$0xff]  }
 0x129   :  { %v3115_v35 = vpop.f32.mrf.mxu1  ;;  %v1861_v9 = vadd.f32 %v3110_v31, %v361_v5  ;;  %v1900_v11 = vadd.f32 %v3112_v32, %v1859_v8 }
 0x12a   :  { %v1862_v34 = vpop.f32.mrf.mxu0 }
 0x12b   :  { %2155 = vmatpush1.bf16.msra.mxu0 %v2902_v30  ;;  %v1903_v38 = vpop.f32.mrf.mxu1  ;;  %v1902_v13 = vadd.f32 %v3115_v35, %v1861_v9 }
 0x12c   :  { %v1863_v37 = vpop.f32.mrf.mxu0  ;;  %2156 = vmatprep.subr.bf16.mxu0 %v2907_v33 }
 0x12d   :  { %v1904_v39 = vpop.f32.mrf.mxu1 }
 0x12f   :  { %2157 = vmatpush1.bf16.msra.mxu0 %v2905_v48 }
 0x130   :  { %2158 = vmatprep.subr.bf16.mxu0 %v2910_v7 }
 0x133   :  { %2159 = vmatpush1.bf16.msra.mxu0 %v2908_v36 }
 0x134   :  { %2160 = vmatprep.subr.bf16.mxu0 %v2913_v52 }
 0x137   :  { %2161 = vmatpush1.bf16.msra.mxu0 %v2911_v40 }
 0x138   :  { %2162 = vmatprep.subr.bf16.mxu0 %v2916_v10 }
 0x13b   :  { %2163 = vmatpush1.bf16.msra.mxu0 %v2914_v41 }
 0x13c   :  { %2164 = vmatprep.subr.bf16.mxu0 %v2919_v42 }
 0x13f   :  { %2165 = vmatpush1.bf16.msra.mxu0 %v2917_v43 }
 0x140   :  { %2166 = vmatprep.subr.bf16.mxu0 %v2922_v44 }
 0x143   :  { %2167 = vmatpush1.bf16.msra.mxu0 %v2920_v45 }
 0x144   :  { %2168 = vmatprep.subr.bf16.mxu0 %v2925_v46 }
 0x147   :  { %2169 = vmatpush2.bf16.msra.mxu0 %v2923_v47 }
 0x148   :  { %2170 = vmatprep.subr.bf16.mxu0 %v2928_v49 }
 0x14b   :  { %2171 = vmatpush2.bf16.msra.mxu0 %v2926_v50  ;;  %v372_v50 = vsub.s32 4, %v3117_v60 }
 0x14c   :  { %2172 = vmatprep.subr.bf16.mxu0 %v2931_v51  ;;  %v376_v51 = vsub.s32 5, %v3117_v60 }
 0x14f   :  { %2173 = vmatpush2.bf16.msra.mxu0 %v2929_v53  ;;  %v373_v53 = vrot.slane %v3120_v0, %v372_v50 }
 0x150   :  { %2174 = vmatprep.subr.bf16.mxu0 %v2934_v54  ;;  %v377_v54 = vrot.slane %v3120_v0, %v376_v51 }
 0x153   :  { %2175 = vmatpush2.bf16.msra.mxu0 %v2932_v55 }
 0x154   :  { %2176 = vmatprep.subr.bf16.mxu0 %v2937_v56 }
 0x157   :  { %2177 = vmatpush2.bf16.msra.mxu0 %v2935_v58 }
 0x158   :  { %2178 = vmatprep.subr.bf16.mxu0 %v2940_v59 }
 0x15b   :  { %2179 = vmatpush2.bf16.msra.mxu0 %v2938_v61 }
 0x15c   :  { %2180 = vmatprep.subr.bf16.mxu0 %v2943_v62 }
 0x15f   :  { %2181 = vmatpush2.bf16.msra.mxu0 %v2941_v2 }
 0x160   :  { %2182 = vmatprep.subr.bf16.mxu0 %v2946_v3 }
 0x163   :  { %2183 = vmatpush2.bf16.msra.mxu0 %v2944_v6 }
 0x166   :  { %v1940_v12 = vpop.f32.mrf.mxu0  ;;  %2185 = vmatmul.mubr.bf16.vlgmr.msra.gmra.mxu0 %v3096_v16  ;;  %v368_v16 = vsub.s32 3, %v3117_v60 }
 0x167   :  { %v1941_v14 = vadd.f32 %v1940_v12, %v1900_v11 }
 0x168   :  { %v1942_v15 = vpop.f32.mrf.mxu0  ;;  %v1981_v17 = vpop.f32.mrf.mxu1  ;;  %v369_v28 = vrot.slane %v3120_v0, %v368_v16 }
 0x169   :  { %2947 = vtanh.f32 %v1941_v14  ;;  %v1943_v18 = vadd.f32 %v1942_v15, %v1902_v13  ;;  %v1982_v29 = vadd.f32 %v1981_v17, %v365_v27 }
 0x16a   :  { %v1944_v19 = vpop.f32.mrf.mxu0  ;;  %v1983_v20 = vpop.f32.mrf.mxu1 }
 0x16b   :  { %2949 = vtanh.f32 %v1943_v18  ;;  %v1984_v30 = vadd.f32 %v1983_v20, %v369_v28 }
 0x16c   :  { %v1945_v21 = vpop.f32.mrf.mxu0  ;;  %v1985_v22 = vpop.f32.mrf.mxu1 }
 0x16e   :  { %v1986_v23 = vpop.f32.mrf.mxu1 }
 0x176   :  { %v2948_v24 = vpop.eup %2947 }
 0x177   :  { %2199 = vst [vmem:[#allocation8] sm:$0xff] %v2948_v24 }
 0x178   :  { %v2950_v25 = vpop.eup %2949 }
 0x179   :  { %2200 = vst [vmem:[#allocation8 + $0x8] sm:$0xff] %v2950_v25 }
 0x1a6   :  { %v2022_v31 = vpop.f32.mrf.mxu0 }
 0x1a7   :  { %v2023_v32 = vadd.f32 %v2022_v31, %v1982_v29 }
 0x1a8   :  { %v2024_v33 = vpop.f32.mrf.mxu0  ;;  %v2063_v34 = vpop.f32.mrf.mxu1 }
 0x1a9   :  { %v2025_v35 = vadd.f32 %v2024_v33, %v1984_v30  ;;  %v2064_v48 = vadd.f32 %v2063_v34, %v2023_v32 }
 0x1aa   :  { %v2026_v37 = vpop.f32.mrf.mxu0  ;;  %v2065_v7 = vpop.f32.mrf.mxu1 }
 0x1ab   :  { %2951 = vtanh.f32 %v2064_v48  ;;  %v2066_v38 = vadd.f32 %v2065_v7, %v2025_v35 }
 0x1ac   :  { %v2027_v39 = vpop.f32.mrf.mxu0  ;;  %v2067_v36 = vpop.f32.mrf.mxu1 }
 0x1ad   :  { %2953 = vtanh.f32 %v2066_v38 }
 0x1ae   :  { %v2068_v52 = vpop.f32.mrf.mxu1 }
 0x1b8   :  { %v2952_v40 = vpop.eup %2951 }
 0x1b9   :  { %2201 = vst [vmem:[#allocation8 + $0x10] sm:$0xff] %v2952_v40 }
 0x1ba   :  { %v2954_v10 = vpop.eup %2953 }
 0x1bb   :  { %2202 = vst [vmem:[#allocation8 + $0x18] sm:$0xff] %v2954_v10 }
 0x1e6   :  { %v2104_v41 = vpop.f32.mrf.mxu0 }
 0x1e7   :  { %v2105_v55 = vadd.f32 %v2104_v41, %v373_v53 }
 0x1e8   :  { %v2106_v42 = vpop.f32.mrf.mxu0  ;;  %v2145_v43 = vpop.f32.mrf.mxu1 }
 0x1e9   :  { %v2107_v56 = vadd.f32 %v2106_v42, %v377_v54  ;;  %v2146_v57 = vadd.f32 %v2145_v43, %v2105_v55 }
 0x1ea   :  { %v2108_v44 = vpop.f32.mrf.mxu0  ;;  %v2147_v45 = vpop.f32.mrf.mxu1 }
 0x1eb   :  { %v2148_v59 = vadd.f32 %v2147_v45, %v2107_v56 }
 0x1ec   :  { %v2109_v46 = vpop.f32.mrf.mxu0  ;;  %v2149_v47 = vpop.f32.mrf.mxu1 }
 0x1ee   :  { %v2150_v49 = vpop.f32.mrf.mxu1 }
 0x226   :  { %v2186_v58 = vpop.f32.mrf.mxu0 }
 0x227   :  { %v2187_v61 = vadd.f32 %v2186_v58, %v2146_v57 }
 0x228   :  { %v2188_v62 = vpop.f32.mrf.mxu0 }
 0x229   :  { %2955 = vtanh.f32 %v2187_v61  ;;  %v2189_v63 = vadd.f32 %v2188_v62, %v2148_v59 }
 0x22a   :  { %v2190_v1 = vpop.f32.mrf.mxu0 }
 0x22b   :  { %2957 = vtanh.f32 %v2189_v63 }
 0x22c   :  { %v2191_v2 = vpop.f32.mrf.mxu0 }
 0x236   :  { %v2956_v3 = vpop.eup %2955 }
 0x237   :  { %2203 = vst [vmem:[#allocation8 + $0x20] sm:$0xff] %v2956_v3 }
 0x238   :  { %v2958_v60 = vpop.eup %2957 }
 0x239   :  { %2204 = vst [vmem:[#allocation8 + $0x28] sm:$0xff] %v2958_v60 }
 0x23a   :  { %3030 = shalt.err (!%p3027_p5)
}
 0x23b   :  { %2214 = dma.vmem_to_hbm [thread:$0]  %s2212_s2, 768, %s3144_s3, [#allocation4]  }
 0x23c   :  { %3043 = dma.done.wait [#allocation4], 768  }
 0x23d   :  { %3044 = vsyncadd [#allocation4], 4294966528 }
 0x23e   :  { %2218 = vsyncpa [#allocation3], 1 }
 0x23f   :  { %2219 = vsyncpa [#allocation6], 1 }
 0x240   :  { %2220 = vsyncpa [#allocation4], 1 }

</bundles_post_ra>
